<compile_context>
chip_gen: v5e
topology: v5e:2x2
jax: 0.10.0
libtpu: 0.0.40
codegen_flags: <defaults>
</compile_context>

<pallas_src>
import functools

import jax
import jax.numpy as jnp
from jax import lax
from jax.experimental import pallas as pl
from jax.experimental.pallas import tpu as pltpu


# ----------------------------------------------------------------------------
# Fused multi-layer tanh RNN (time-chunked grid, hidden state in VMEM scratch)
# ----------------------------------------------------------------------------
def _fused_rnn_kernel(*refs, num_layers, t_chunk, nb, unroll):
    """refs = [x2d, (w_ih, w_hh, b) * L, out2d, h_scratch * L, z_scratch].

    x2d block:   (t_chunk * nb, I)  -- time-major rows (t major, nb minor)
    out2d block: (t_chunk * nb, H)
    z_scratch:   (t_chunk * nb, H)  -- reused by every layer
    """
    x_ref = refs[0]
    w_refs = refs[1:1 + 3 * num_layers]
    out_ref = refs[1 + 3 * num_layers]
    h_refs = refs[2 + 3 * num_layers: 2 + 3 * num_layers + num_layers]
    z_ref = refs[-1]

    @pl.when(pl.program_id(0) == 0)
    def _init():
        for h_ref in h_refs:
            h_ref[...] = jnp.zeros_like(h_ref)

    for l in range(num_layers):
        w_ih = w_refs[3 * l][...]
        w_hh = w_refs[3 * l + 1][...]
        b = w_refs[3 * l + 2][...]

        # Input projection for the WHOLE chunk: one big MXU matmul per layer
        # (instead of t_chunk tiny per-step matmuls inside the recurrence).
        src_ref = x_ref if l == 0 else z_ref
        z_ref[...] = (jnp.dot(src_ref[...], w_ih,
                              preferred_element_type=jnp.float32) + b)

        is_last = (l == num_layers - 1)
        dst_ref = out_ref if is_last else z_ref

        # Serial recurrence: per step only one (nb,H)@(H,H) matmul + tanh.
        def step(t, h, _w_hh=w_hh, _dst=dst_ref):
            row = pl.multiple_of(t * nb, nb)
            h_new = jnp.tanh(
                z_ref[pl.ds(row, nb), :]
                + jnp.dot(h, _w_hh, preferred_element_type=jnp.float32))
            _dst[pl.ds(row, nb), :] = h_new.astype(_dst.dtype)
            return h_new

        h_refs[l][...] = lax.fori_loop(0, t_chunk, step, h_refs[l][...],
                                       unroll=unroll)


def fused_rnn(x_tm, rnn_params, *, t_chunk=None):
    """x_tm: (T, NB, I) time-major; rnn_params: [(w_ih(I,H), w_hh(H,H), b(1,H))]."""
    T, NB, I = x_tm.shape
    H = rnn_params[0][1].shape[0]
    num_layers = len(rnn_params)
    if t_chunk is None:
        # Amortize the ~0.35us/grid-step pipeline overhead with large time
        # chunks while keeping the VMEM-resident slabs small (v7x: 64 MiB).
        t_chunk = T
        while (t_chunk * NB * (I + 2 * H) * 4 > 8 * 1024 * 1024
               and t_chunk % 2 == 0):
            t_chunk //= 2
    assert T % t_chunk == 0, "T must be divisible by t_chunk"

    x2d = x_tm.reshape(T * NB, I)

    in_specs = [pl.BlockSpec((t_chunk * NB, I), lambda c: (c, 0))]
    flat_w = []
    for (w_ih, w_hh, b) in rnn_params:
        # Weights have constant index_maps -> DMA'd into VMEM once, reused.
        in_specs += [pl.BlockSpec(w_ih.shape, lambda c: (0, 0)),
                     pl.BlockSpec(w_hh.shape, lambda c: (0, 0)),
                     pl.BlockSpec(b.shape, lambda c: (0, 0))]
        flat_w += [w_ih, w_hh, b]

    flops = 0
    bytes_accessed = (x2d.size + T * NB * H) * 4
    for (w_ih, w_hh, b) in rnn_params:
        flops += 2 * T * NB * (w_ih.shape[0] * H + H * H)
        bytes_accessed += (w_ih.size + w_hh.size + b.size) * 4
    transcendentals = T * NB * H * num_layers

    kernel = functools.partial(_fused_rnn_kernel, num_layers=num_layers,
                               t_chunk=t_chunk, nb=NB,
                               unroll=min(t_chunk, 8))
    return pl.pallas_call(
        kernel,
        out_shape=jax.ShapeDtypeStruct((T * NB, H), jnp.float32),
        grid_spec=pltpu.PrefetchScalarGridSpec(
            num_scalar_prefetch=0,
            grid=(T // t_chunk,),
            in_specs=in_specs,
            out_specs=pl.BlockSpec((t_chunk * NB, H), lambda c: (c, 0)),
            scratch_shapes=[pltpu.VMEM((NB, H), jnp.float32)
                            for _ in range(num_layers)]
                           + [pltpu.VMEM((t_chunk * NB, H), jnp.float32)]),
        compiler_params=pltpu.CompilerParams(
            # The time-chunk axis carries the hidden state -> must stay serial.
            dimension_semantics=("arbitrary",),
            vmem_limit_bytes=32 * 1024 * 1024),
        cost_estimate=pl.CostEstimate(flops=int(flops),
                                      transcendentals=int(transcendentals),
                                      bytes_accessed=int(bytes_accessed)),
    )(x2d, *flat_w)


# ----------------------------------------------------------------------------
# Fused MLP heads (pulse + critic in one pallas_call, intermediates in VMEM)
# ----------------------------------------------------------------------------
def _fused_mlp_kernel(*refs, head_sizes):
    """refs = [x, (w, b) pairs for each head ..., one out_ref per head]."""
    x_ref = refs[0]
    idx = 1
    heads = []
    for n in head_sizes:
        heads.append(refs[idx: idx + 2 * n])
        idx += 2 * n
    out_refs = refs[idx:]

    x = x_ref[...]                     # feature slab loaded once, shared
    for head, o_ref in zip(heads, out_refs):
        h = x
        n = len(head) // 2
        for i in range(n):
            w = head[2 * i][...]
            b = head[2 * i + 1][...]
            h = jnp.dot(h, w, preferred_element_type=jnp.float32) + b
            if i < n - 1:
                h = jnp.maximum(h, 0.0)          # ReLU on hidden layers only
        o_ref[...] = h.astype(o_ref.dtype)


def fused_mlp_heads(x, heads):
    """x: (M, F). heads: list of [(w(K,N), b(1,N)), ...]. One output per head."""
    M, F = x.shape
    tm = M
    if M > 256:
        for cand in (256, 128, 64, 32, 16, 8):
            if M % cand == 0:
                tm = cand
                break
    grid = (M // tm,)

    in_specs = [pl.BlockSpec((tm, F), lambda i: (i, 0))]
    flat_w, out_shapes, out_specs = [], [], []
    flops, bytes_accessed = 0, x.size * 4
    for head in heads:
        for (w, b) in head:
            in_specs += [pl.BlockSpec(w.shape, lambda i: (0, 0)),
                         pl.BlockSpec(b.shape, lambda i: (0, 0))]
            flat_w += [w, b]
            flops += 2 * M * w.shape[0] * w.shape[1]
            bytes_accessed += (w.size + b.size) * 4
        n_out = head[-1][0].shape[1]
        out_shapes.append(jax.ShapeDtypeStruct((M, n_out), jnp.float32))
        out_specs.append(pl.BlockSpec((tm, n_out), lambda i: (i, 0)))
        bytes_accessed += M * n_out * 4

    kernel = functools.partial(_fused_mlp_kernel,
                               head_sizes=tuple(len(h) for h in heads))
    outs = pl.pallas_call(
        kernel,
        out_shape=tuple(out_shapes),
        grid_spec=pltpu.PrefetchScalarGridSpec(
            num_scalar_prefetch=0,
            grid=grid,
            in_specs=in_specs,
            out_specs=tuple(out_specs)),
        compiler_params=pltpu.CompilerParams(
            # Rows are independent -> M tiles can shard across TensorCores.
            dimension_semantics=("parallel",),
            vmem_limit_bytes=32 * 1024 * 1024),
        cost_estimate=pl.CostEstimate(flops=int(flops), transcendentals=0,
                                      bytes_accessed=int(bytes_accessed)),
    )(x, *flat_w)
    if not isinstance(outs, (list, tuple)):
        outs = (outs,)
    return list(outs)


# ----------------------------------------------------------------------------
# Parameter construction (deterministic, PyTorch-like uniform init)
# ----------------------------------------------------------------------------
def _uniform(key, shape, bound):
    return jax.random.uniform(key, shape, jnp.float32, -bound, bound)


def init_params(key, *, hidden_size, num_layers, pulse_layers_size,
                critic_layer_size, input_common_size, input_per_level_size,
                n_targets, output_common_size):
    rnn_input_size = input_common_size + input_per_level_size + 1
    params = {"rnn": [], "pulse": [], "critic": []}

    bound = 1.0 / jnp.sqrt(hidden_size)
    for layer in range(num_layers):
        in_sz = rnn_input_size if layer == 0 else hidden_size
        key, k1, k2, k3, k4 = jax.random.split(key, 5)
        w_ih = _uniform(k1, (in_sz, hidden_size), bound)        # stored (I, H)
        w_hh = _uniform(k2, (hidden_size, hidden_size), bound)  # stored (H, H)
        b_ih = _uniform(k3, (1, hidden_size), bound)
        b_hh = _uniform(k4, (1, hidden_size), bound)
        params["rnn"].append((w_ih, w_hh, b_ih + b_hh))

    def make_mlp(key, sizes):
        layers = []
        for i in range(1, len(sizes)):
            key, k1, k2 = jax.random.split(key, 3)
            bnd = 1.0 / jnp.sqrt(sizes[i - 1])
            w = _uniform(k1, (sizes[i - 1], sizes[i]), bnd)
            b = _uniform(k2, (1, sizes[i]), bnd)
            layers.append((w, b))
        return key, layers

    feat = hidden_size * n_targets
    key, params["pulse"] = make_mlp(
        key, [feat] + list(pulse_layers_size) + [output_common_size])
    key, params["critic"] = make_mlp(
        key, [feat] + list(critic_layer_size) + [1])
    return params


# ----------------------------------------------------------------------------
# Forward pass (mirrors PulseOnlyNN.forward)
# ----------------------------------------------------------------------------
def pulse_only_nn_forward(params, in_data_common, in_data_per_level, targets,
                          *, n_targets, targets_range, hidden_size,
                          critic=True):
    # in_data_common:    (batch, n_steps, input_common_size)
    # in_data_per_level: (batch, n_steps, n_targets, input_per_level_size)
    # targets:           (n_targets,)
    t_norm = (targets - targets_range / 2.0) / targets_range
    batch, n_steps, _ = in_data_common.shape
    unit = jnp.ones((batch, n_steps, 1), jnp.float32)

    # Stacked RNN input: (n_targets * batch, n_steps, input_size)
    chunks = []
    for i in range(n_targets):
        chunks.append(jnp.concatenate(
            [in_data_common, t_norm[i] * unit, in_data_per_level[:, :, i]],
            axis=-1).astype(jnp.float32))
    input_rnn = jnp.concatenate(chunks, axis=0)           # (NB, T, I)

    # Time-major, fused multi-layer recurrence in a single Pallas kernel.
    x_tm = jnp.transpose(input_rnn, (1, 0, 2))            # (T, NB, I)
    out2d = fused_rnn(x_tm, params["rnn"])                # (T*NB, H)

    # flat[b*T + t, i*H + h] == out2d[t*NB + i*batch + b, h]
    flat = (out2d.reshape(n_steps, n_targets, batch, hidden_size)
                 .transpose(2, 0, 1, 3)
                 .reshape(batch * n_steps, n_targets * hidden_size))

    heads = [params["pulse"]] + ([params["critic"]] if critic else [])
    outs = fused_mlp_heads(flat, heads)
    pulse_policy = outs[0].reshape(batch, n_steps, -1)
    critic_out = outs[1].reshape(batch, n_steps, 1) if critic else None
    return pulse_policy, critic_out


# ----------------------------------------------------------------------------
# Pure-JAX reference (correctness sanity check)
# ----------------------------------------------------------------------------
def _reference_forward(params, in_data_common, in_data_per_level, targets,
                       *, n_targets, targets_range, hidden_size):
    t_norm = (targets - targets_range / 2.0) / targets_range
    batch, n_steps, _ = in_data_common.shape
    unit = jnp.ones((batch, n_steps, 1), jnp.float32)
    chunks = [jnp.concatenate(
        [in_data_common, t_norm[i] * unit, in_data_per_level[:, :, i]],
        axis=-1) for i in range(n_targets)]
    x = jnp.concatenate(chunks, axis=0)                   # (NB, T, I)
    NB = x.shape[0]
    for (w_ih, w_hh, b) in params["rnn"]:
        def step(h, x_t):
            h_new = jnp.tanh(x_t @ w_ih + h @ w_hh + b)
            return h_new, h_new
        _, ys = jax.lax.scan(step, jnp.zeros((NB, hidden_size), jnp.float32),
                             jnp.transpose(x, (1, 0, 2)))
        x = jnp.transpose(ys, (1, 0, 2))
    output = x.reshape(n_targets, batch, n_steps, hidden_size)
    input_agents = jnp.concatenate([output[i] for i in range(n_targets)],
                                   axis=-1)
    flat = input_agents.reshape(batch * n_steps, -1)

    def run_mlp(layers, h):
        for (w, b) in layers[:-1]:
            h = jnp.maximum(h @ w + b, 0.0)
        w, b = layers[-1]
        return h @ w + b

    return (run_mlp(params["pulse"], flat).reshape(batch, n_steps, -1),
            run_mlp(params["critic"], flat).reshape(batch, n_steps, 1))


if __name__ == "__main__":
    # Small module hyper-parameters consistent with __init__ / forward.
    hidden_size = 32
    num_layers = 2
    pulse_layers_size = [64]
    critic_layer_size = [64]
    input_common_size = 4
    input_per_level_size = 3
    n_targets = 4
    targets_range = 10.0
    output_common_size = 8

    batch, n_steps = 2, 8

    key = jax.random.PRNGKey(0)
    kp, kc, kl, kt = jax.random.split(key, 4)

    params = init_params(
        kp, hidden_size=hidden_size, num_layers=num_layers,
        pulse_layers_size=pulse_layers_size,
        critic_layer_size=critic_layer_size,
        input_common_size=input_common_size,
        input_per_level_size=input_per_level_size,
        n_targets=n_targets, output_common_size=output_common_size)

    in_data_common = jax.random.normal(
        kc, (batch, n_steps, input_common_size), jnp.float32)
    in_data_per_level = jax.random.normal(
        kl, (batch, n_steps, n_targets, input_per_level_size), jnp.float32)
    targets = jax.random.uniform(
        kt, (n_targets,), jnp.float32, 0.0, targets_range)

    pulse_policy, critic_out = pulse_only_nn_forward(
        params, in_data_common, in_data_per_level, targets,
        n_targets=n_targets, targets_range=targets_range,
        hidden_size=hidden_size, critic=True)
    jax.block_until_ready((pulse_policy, critic_out))

    ref_pulse, ref_critic = _reference_forward(
        params, in_data_common, in_data_per_level, targets,
        n_targets=n_targets, targets_range=targets_range,
        hidden_size=hidden_size)

    assert pulse_policy.shape == (batch, n_steps, output_common_size)
    assert critic_out.shape == (batch, n_steps, 1)
    assert jnp.allclose(pulse_policy, ref_pulse, atol=5e-3, rtol=5e-3)
    assert jnp.allclose(critic_out, ref_critic, atol=5e-3, rtol=5e-3)

    # TODO(synk): single_step/reset (stateful hidden-state caching) is not
    # implemented; only the batched forward() path is covered.
    print("KERNEL_OK")
</pallas_src>

<mosaic_0001>
module attributes {stable_mosaic.version = 11 : i64} {
  func.func @_fused_rnn_kernel(%arg0: i32, %arg1: memref<64x8xf32, #tpu.memory_space<vmem>>, %arg2: memref<8x32xf32, #tpu.memory_space<vmem>>, %arg3: memref<32x32xf32, #tpu.memory_space<vmem>>, %arg4: memref<1x32xf32, #tpu.memory_space<vmem>>, %arg5: memref<32x32xf32, #tpu.memory_space<vmem>>, %arg6: memref<32x32xf32, #tpu.memory_space<vmem>>, %arg7: memref<1x32xf32, #tpu.memory_space<vmem>>, %arg8: memref<64x32xf32, #tpu.memory_space<vmem>>, %arg9: memref<8x32xf32, #tpu.memory_space<vmem>>, %arg10: memref<8x32xf32, #tpu.memory_space<vmem>>, %arg11: memref<64x32xf32, #tpu.memory_space<vmem>>) attributes {dimension_semantics = [#tpu.dimension_semantics<arbitrary>], iteration_bounds = array<i64: 1>, scalar_prefetch = 0 : i64, scratch_operands = 3 : i64, tpu.core_type = #tpu.core_type<tc>, window_params = [{transform_indices = @transform_0, window_bounds = array<i64: 64, 8>}, {pipeline_mode = #tpu.pipeline_mode<synchronous>, transform_indices = @transform_1, window_bounds = array<i64: 8, 32>}, {pipeline_mode = #tpu.pipeline_mode<synchronous>, transform_indices = @transform_2, window_bounds = array<i64: 32, 32>}, {pipeline_mode = #tpu.pipeline_mode<synchronous>, transform_indices = @transform_3, window_bounds = array<i64: 1, 32>}, {pipeline_mode = #tpu.pipeline_mode<synchronous>, transform_indices = @transform_4, window_bounds = array<i64: 32, 32>}, {pipeline_mode = #tpu.pipeline_mode<synchronous>, transform_indices = @transform_5, window_bounds = array<i64: 32, 32>}, {pipeline_mode = #tpu.pipeline_mode<synchronous>, transform_indices = @transform_6, window_bounds = array<i64: 1, 32>}, {transform_indices = @transform_7, window_bounds = array<i64: 64, 32>}]} {
    %c0_i32 = arith.constant 0 : i32
    %0 = arith.cmpi eq, %arg0, %c0_i32 : i32
    %1 = arith.extui %0 : i1 to i32
    %c0_i32_0 = arith.constant 0 : i32
    %2 = arith.cmpi ne, %1, %c0_i32_0 : i32
    scf.if %2 {
      %cst_103 = arith.constant 0.000000e+00 : f32
      %167 = vector.broadcast %cst_103 : f32 to vector<8x32xf32>
      %c0_104 = arith.constant 0 : index
      %c0_105 = arith.constant 0 : index
      %168 = vector.load %arg9[%c0_104, %c0_105] : memref<8x32xf32, #tpu.memory_space<vmem>>, vector<8x32xf32>
      tpu.vector_store %arg9[%c0_104, %c0_105], %167 {strides = array<i32>} : memref<8x32xf32, #tpu.memory_space<vmem>>, vector<8x32xf32>,
      %cst_106 = arith.constant 0.000000e+00 : f32
      %169 = vector.broadcast %cst_106 : f32 to vector<8x32xf32>
      %c0_107 = arith.constant 0 : index
      %c0_108 = arith.constant 0 : index
      %170 = vector.load %arg10[%c0_107, %c0_108] : memref<8x32xf32, #tpu.memory_space<vmem>>, vector<8x32xf32>
      tpu.vector_store %arg10[%c0_107, %c0_108], %169 {strides = array<i32>} : memref<8x32xf32, #tpu.memory_space<vmem>>, vector<8x32xf32>,
    } else {
    }
    %c0 = arith.constant 0 : index
    %c0_1 = arith.constant 0 : index
    %3 = vector.load %arg2[%c0, %c0_1] : memref<8x32xf32, #tpu.memory_space<vmem>>, vector<8x32xf32>
    %c0_2 = arith.constant 0 : index
    %c0_3 = arith.constant 0 : index
    %4 = vector.load %arg3[%c0_2, %c0_3] : memref<32x32xf32, #tpu.memory_space<vmem>>, vector<32x32xf32>
    %c0_4 = arith.constant 0 : index
    %c0_5 = arith.constant 0 : index
    %5 = vector.load %arg4[%c0_4, %c0_5] : memref<1x32xf32, #tpu.memory_space<vmem>>, vector<1x32xf32>
    %c0_6 = arith.constant 0 : index
    %c0_7 = arith.constant 0 : index
    %6 = vector.load %arg1[%c0_6, %c0_7] : memref<64x8xf32, #tpu.memory_space<vmem>>, vector<64x8xf32>
    %cst = arith.constant dense<0.000000e+00> : vector<64x32xf32>
    %7 = tpu.matmul %6, %3, %cst {dimension_numbers = #tpu.dot_dimension_numbers<[1], [0], [0], [1], [0, 0, 1, 1], [], []>} : vector<64x8xf32>, vector<8x32xf32>, vector<64x32xf32> -> vector<64x32xf32>
    %8 = vector.broadcast %5 : vector<1x32xf32> to vector<64x32xf32>
    %9 = arith.addf %7, %8 : vector<64x32xf32>
    %c0_8 = arith.constant 0 : index
    %c0_9 = arith.constant 0 : index
    %10 = vector.load %arg11[%c0_8, %c0_9] : memref<64x32xf32, #tpu.memory_space<vmem>>, vector<64x32xf32>
    tpu.vector_store %arg11[%c0_8, %c0_9], %9 {strides = array<i32>} : memref<64x32xf32, #tpu.memory_space<vmem>>, vector<64x32xf32>,
    %c0_10 = arith.constant 0 : index
    %c0_11 = arith.constant 0 : index
    %11 = vector.load %arg9[%c0_10, %c0_11] : memref<8x32xf32, #tpu.memory_space<vmem>>, vector<8x32xf32>
    %c0_i32_12 = arith.constant 0 : i32
    %c8_i32 = arith.constant 8 : i32
    %12 = arith.muli %c0_i32_12, %c8_i32 : i32
    %13 = tpu.assume_multiple %12, 8 : i32
    %14 = arith.index_cast %13 : i32 to index
    %c0_13 = arith.constant 0 : index
    %15 = vector.load %arg11[%14, %c0_13] : memref<64x32xf32, #tpu.memory_space<vmem>>, vector<8x32xf32>
    %cst_14 = arith.constant dense<0.000000e+00> : vector<8x32xf32>
    %16 = tpu.matmul %11, %4, %cst_14 {dimension_numbers = #tpu.dot_dimension_numbers<[1], [0], [0], [1], [0, 0, 1, 1], [], []>} : vector<8x32xf32>, vector<32x32xf32>, vector<8x32xf32> -> vector<8x32xf32>
    %17 = arith.addf %15, %16 : vector<8x32xf32>
    %18 = math.tanh %17 : vector<8x32xf32>
    %19 = arith.index_cast %13 : i32 to index
    %c0_15 = arith.constant 0 : index
    %20 = vector.load %arg11[%19, %c0_15] : memref<64x32xf32, #tpu.memory_space<vmem>>, vector<8x32xf32>
    tpu.vector_store %arg11[%19, %c0_15], %18 {strides = array<i32>} : memref<64x32xf32, #tpu.memory_space<vmem>>, vector<8x32xf32>,
    %c1_i32 = arith.constant 1 : i32
    %c8_i32_16 = arith.constant 8 : i32
    %21 = arith.muli %c1_i32, %c8_i32_16 : i32
    %22 = tpu.assume_multiple %21, 8 : i32
    %23 = arith.index_cast %22 : i32 to index
    %c0_17 = arith.constant 0 : index
    %24 = vector.load %arg11[%23, %c0_17] : memref<64x32xf32, #tpu.memory_space<vmem>>, vector<8x32xf32>
    %cst_18 = arith.constant dense<0.000000e+00> : vector<8x32xf32>
    %25 = tpu.matmul %18, %4, %cst_18 {dimension_numbers = #tpu.dot_dimension_numbers<[1], [0], [0], [1], [0, 0, 1, 1], [], []>} : vector<8x32xf32>, vector<32x32xf32>, vector<8x32xf32> -> vector<8x32xf32>
    %26 = arith.addf %24, %25 : vector<8x32xf32>
    %27 = math.tanh %26 : vector<8x32xf32>
    %28 = arith.index_cast %22 : i32 to index
    %c0_19 = arith.constant 0 : index
    %29 = vector.load %arg11[%28, %c0_19] : memref<64x32xf32, #tpu.memory_space<vmem>>, vector<8x32xf32>
    tpu.vector_store %arg11[%28, %c0_19], %27 {strides = array<i32>} : memref<64x32xf32, #tpu.memory_space<vmem>>, vector<8x32xf32>,
    %c2_i32 = arith.constant 2 : i32
    %c8_i32_20 = arith.constant 8 : i32
    %30 = arith.muli %c2_i32, %c8_i32_20 : i32
    %31 = tpu.assume_multiple %30, 8 : i32
    %32 = arith.index_cast %31 : i32 to index
    %c0_21 = arith.constant 0 : index
    %33 = vector.load %arg11[%32, %c0_21] : memref<64x32xf32, #tpu.memory_space<vmem>>, vector<8x32xf32>
    %cst_22 = arith.constant dense<0.000000e+00> : vector<8x32xf32>
    %34 = tpu.matmul %27, %4, %cst_22 {dimension_numbers = #tpu.dot_dimension_numbers<[1], [0], [0], [1], [0, 0, 1, 1], [], []>} : vector<8x32xf32>, vector<32x32xf32>, vector<8x32xf32> -> vector<8x32xf32>
    %35 = arith.addf %33, %34 : vector<8x32xf32>
    %36 = math.tanh %35 : vector<8x32xf32>
    %37 = arith.index_cast %31 : i32 to index
    %c0_23 = arith.constant 0 : index
    %38 = vector.load %arg11[%37, %c0_23] : memref<64x32xf32, #tpu.memory_space<vmem>>, vector<8x32xf32>
    tpu.vector_store %arg11[%37, %c0_23], %36 {strides = array<i32>} : memref<64x32xf32, #tpu.memory_space<vmem>>, vector<8x32xf32>,
    %c3_i32 = arith.constant 3 : i32
    %c8_i32_24 = arith.constant 8 : i32
    %39 = arith.muli %c3_i32, %c8_i32_24 : i32
    %40 = tpu.assume_multiple %39, 8 : i32
    %41 = arith.index_cast %40 : i32 to index
    %c0_25 = arith.constant 0 : index
    %42 = vector.load %arg11[%41, %c0_25] : memref<64x32xf32, #tpu.memory_space<vmem>>, vector<8x32xf32>
    %cst_26 = arith.constant dense<0.000000e+00> : vector<8x32xf32>
    %43 = tpu.matmul %36, %4, %cst_26 {dimension_numbers = #tpu.dot_dimension_numbers<[1], [0], [0], [1], [0, 0, 1, 1], [], []>} : vector<8x32xf32>, vector<32x32xf32>, vector<8x32xf32> -> vector<8x32xf32>
    %44 = arith.addf %42, %43 : vector<8x32xf32>
    %45 = math.tanh %44 : vector<8x32xf32>
    %46 = arith.index_cast %40 : i32 to index
    %c0_27 = arith.constant 0 : index
    %47 = vector.load %arg11[%46, %c0_27] : memref<64x32xf32, #tpu.memory_space<vmem>>, vector<8x32xf32>
    tpu.vector_store %arg11[%46, %c0_27], %45 {strides = array<i32>} : memref<64x32xf32, #tpu.memory_space<vmem>>, vector<8x32xf32>,
    %c4_i32 = arith.constant 4 : i32
    %c8_i32_28 = arith.constant 8 : i32
    %48 = arith.muli %c4_i32, %c8_i32_28 : i32
    %49 = tpu.assume_multiple %48, 8 : i32
    %50 = arith.index_cast %49 : i32 to index
    %c0_29 = arith.constant 0 : index
    %51 = vector.load %arg11[%50, %c0_29] : memref<64x32xf32, #tpu.memory_space<vmem>>, vector<8x32xf32>
    %cst_30 = arith.constant dense<0.000000e+00> : vector<8x32xf32>
    %52 = tpu.matmul %45, %4, %cst_30 {dimension_numbers = #tpu.dot_dimension_numbers<[1], [0], [0], [1], [0, 0, 1, 1], [], []>} : vector<8x32xf32>, vector<32x32xf32>, vector<8x32xf32> -> vector<8x32xf32>
    %53 = arith.addf %51, %52 : vector<8x32xf32>
    %54 = math.tanh %53 : vector<8x32xf32>
    %55 = arith.index_cast %49 : i32 to index
    %c0_31 = arith.constant 0 : index
    %56 = vector.load %arg11[%55, %c0_31] : memref<64x32xf32, #tpu.memory_space<vmem>>, vector<8x32xf32>
    tpu.vector_store %arg11[%55, %c0_31], %54 {strides = array<i32>} : memref<64x32xf32, #tpu.memory_space<vmem>>, vector<8x32xf32>,
    %c5_i32 = arith.constant 5 : i32
    %c8_i32_32 = arith.constant 8 : i32
    %57 = arith.muli %c5_i32, %c8_i32_32 : i32
    %58 = tpu.assume_multiple %57, 8 : i32
    %59 = arith.index_cast %58 : i32 to index
    %c0_33 = arith.constant 0 : index
    %60 = vector.load %arg11[%59, %c0_33] : memref<64x32xf32, #tpu.memory_space<vmem>>, vector<8x32xf32>
    %cst_34 = arith.constant dense<0.000000e+00> : vector<8x32xf32>
    %61 = tpu.matmul %54, %4, %cst_34 {dimension_numbers = #tpu.dot_dimension_numbers<[1], [0], [0], [1], [0, 0, 1, 1], [], []>} : vector<8x32xf32>, vector<32x32xf32>, vector<8x32xf32> -> vector<8x32xf32>
    %62 = arith.addf %60, %61 : vector<8x32xf32>
    %63 = math.tanh %62 : vector<8x32xf32>
    %64 = arith.index_cast %58 : i32 to index
    %c0_35 = arith.constant 0 : index
    %65 = vector.load %arg11[%64, %c0_35] : memref<64x32xf32, #tpu.memory_space<vmem>>, vector<8x32xf32>
    tpu.vector_store %arg11[%64, %c0_35], %63 {strides = array<i32>} : memref<64x32xf32, #tpu.memory_space<vmem>>, vector<8x32xf32>,
    %c6_i32 = arith.constant 6 : i32
    %c8_i32_36 = arith.constant 8 : i32
    %66 = arith.muli %c6_i32, %c8_i32_36 : i32
    %67 = tpu.assume_multiple %66, 8 : i32
    %68 = arith.index_cast %67 : i32 to index
    %c0_37 = arith.constant 0 : index
    %69 = vector.load %arg11[%68, %c0_37] : memref<64x32xf32, #tpu.memory_space<vmem>>, vector<8x32xf32>
    %cst_38 = arith.constant dense<0.000000e+00> : vector<8x32xf32>
    %70 = tpu.matmul %63, %4, %cst_38 {dimension_numbers = #tpu.dot_dimension_numbers<[1], [0], [0], [1], [0, 0, 1, 1], [], []>} : vector<8x32xf32>, vector<32x32xf32>, vector<8x32xf32> -> vector<8x32xf32>
    %71 = arith.addf %69, %70 : vector<8x32xf32>
    %72 = math.tanh %71 : vector<8x32xf32>
    %73 = arith.index_cast %67 : i32 to index
    %c0_39 = arith.constant 0 : index
    %74 = vector.load %arg11[%73, %c0_39] : memref<64x32xf32, #tpu.memory_space<vmem>>, vector<8x32xf32>
    tpu.vector_store %arg11[%73, %c0_39], %72 {strides = array<i32>} : memref<64x32xf32, #tpu.memory_space<vmem>>, vector<8x32xf32>,
    %c7_i32 = arith.constant 7 : i32
    %c8_i32_40 = arith.constant 8 : i32
    %75 = arith.muli %c7_i32, %c8_i32_40 : i32
    %76 = tpu.assume_multiple %75, 8 : i32
    %77 = arith.index_cast %76 : i32 to index
    %c0_41 = arith.constant 0 : index
    %78 = vector.load %arg11[%77, %c0_41] : memref<64x32xf32, #tpu.memory_space<vmem>>, vector<8x32xf32>
    %cst_42 = arith.constant dense<0.000000e+00> : vector<8x32xf32>
    %79 = tpu.matmul %72, %4, %cst_42 {dimension_numbers = #tpu.dot_dimension_numbers<[1], [0], [0], [1], [0, 0, 1, 1], [], []>} : vector<8x32xf32>, vector<32x32xf32>, vector<8x32xf32> -> vector<8x32xf32>
    %80 = arith.addf %78, %79 : vector<8x32xf32>
    %81 = math.tanh %80 : vector<8x32xf32>
    %82 = arith.index_cast %76 : i32 to index
    %c0_43 = arith.constant 0 : index
    %83 = vector.load %arg11[%82, %c0_43] : memref<64x32xf32, #tpu.memory_space<vmem>>, vector<8x32xf32>
    tpu.vector_store %arg11[%82, %c0_43], %81 {strides = array<i32>} : memref<64x32xf32, #tpu.memory_space<vmem>>, vector<8x32xf32>,
    %c8_i32_44 = arith.constant 8 : i32
    %c0_45 = arith.constant 0 : index
    %c0_46 = arith.constant 0 : index
    %84 = vector.load %arg9[%c0_45, %c0_46] : memref<8x32xf32, #tpu.memory_space<vmem>>, vector<8x32xf32>
    tpu.vector_store %arg9[%c0_45, %c0_46], %81 {strides = array<i32>} : memref<8x32xf32, #tpu.memory_space<vmem>>, vector<8x32xf32>,
    %c0_47 = arith.constant 0 : index
    %c0_48 = arith.constant 0 : index
    %85 = vector.load %arg5[%c0_47, %c0_48] : memref<32x32xf32, #tpu.memory_space<vmem>>, vector<32x32xf32>
    %c0_49 = arith.constant 0 : index
    %c0_50 = arith.constant 0 : index
    %86 = vector.load %arg6[%c0_49, %c0_50] : memref<32x32xf32, #tpu.memory_space<vmem>>, vector<32x32xf32>
    %c0_51 = arith.constant 0 : index
    %c0_52 = arith.constant 0 : index
    %87 = vector.load %arg7[%c0_51, %c0_52] : memref<1x32xf32, #tpu.memory_space<vmem>>, vector<1x32xf32>
    %c0_53 = arith.constant 0 : index
    %c0_54 = arith.constant 0 : index
    %88 = vector.load %arg11[%c0_53, %c0_54] : memref<64x32xf32, #tpu.memory_space<vmem>>, vector<64x32xf32>
    %cst_55 = arith.constant dense<0.000000e+00> : vector<64x32xf32>
    %89 = tpu.matmul %88, %85, %cst_55 {dimension_numbers = #tpu.dot_dimension_numbers<[1], [0], [0], [1], [0, 0, 1, 1], [], []>} : vector<64x32xf32>, vector<32x32xf32>, vector<64x32xf32> -> vector<64x32xf32>
    %90 = vector.broadcast %87 : vector<1x32xf32> to vector<64x32xf32>
    %91 = arith.addf %89, %90 : vector<64x32xf32>
    %c0_56 = arith.constant 0 : index
    %c0_57 = arith.constant 0 : index
    %92 = vector.load %arg11[%c0_56, %c0_57] : memref<64x32xf32, #tpu.memory_space<vmem>>, vector<64x32xf32>
    tpu.vector_store %arg11[%c0_56, %c0_57], %91 {strides = array<i32>} : memref<64x32xf32, #tpu.memory_space<vmem>>, vector<64x32xf32>,
    %c0_58 = arith.constant 0 : index
    %c0_59 = arith.constant 0 : index
    %93 = vector.load %arg10[%c0_58, %c0_59] : memref<8x32xf32, #tpu.memory_space<vmem>>, vector<8x32xf32>
    %c0_i32_60 = arith.constant 0 : i32
    %c8_i32_61 = arith.constant 8 : i32
    %94 = arith.muli %c0_i32_60, %c8_i32_61 : i32
    %95 = tpu.assume_multiple %94, 8 : i32
    %96 = arith.index_cast %95 : i32 to index
    %c0_62 = arith.constant 0 : index
    %97 = vector.load %arg11[%96, %c0_62] : memref<64x32xf32, #tpu.memory_space<vmem>>, vector<8x32xf32>
    %cst_63 = arith.constant dense<0.000000e+00> : vector<8x32xf32>
    %98 = tpu.matmul %93, %86, %cst_63 {dimension_numbers = #tpu.dot_dimension_numbers<[1], [0], [0], [1], [0, 0, 1, 1], [], []>} : vector<8x32xf32>, vector<32x32xf32>, vector<8x32xf32> -> vector<8x32xf32>
    %99 = arith.addf %97, %98 : vector<8x32xf32>
    %100 = math.tanh %99 : vector<8x32xf32>
    %101 = arith.index_cast %95 : i32 to index
    %c0_64 = arith.constant 0 : index
    %102 = vector.load %arg8[%101, %c0_64] : memref<64x32xf32, #tpu.memory_space<vmem>>, vector<8x32xf32>
    tpu.vector_store %arg8[%101, %c0_64], %100 {strides = array<i32>} : memref<64x32xf32, #tpu.memory_space<vmem>>, vector<8x32xf32>,
    %c1_i32_65 = arith.constant 1 : i32
    %c8_i32_66 = arith.constant 8 : i32
    %103 = arith.muli %c1_i32_65, %c8_i32_66 : i32
    %104 = tpu.assume_multiple %103, 8 : i32
    %105 = arith.index_cast %104 : i32 to index
    %c0_67 = arith.constant 0 : index
    %106 = vector.load %arg11[%105, %c0_67] : memref<64x32xf32, #tpu.memory_space<vmem>>, vector<8x32xf32>
    %cst_68 = arith.constant dense<0.000000e+00> : vector<8x32xf32>
    %107 = tpu.matmul %100, %86, %cst_68 {dimension_numbers = #tpu.dot_dimension_numbers<[1], [0], [0], [1], [0, 0, 1, 1], [], []>} : vector<8x32xf32>, vector<32x32xf32>, vector<8x32xf32> -> vector<8x32xf32>
    %108 = arith.addf %106, %107 : vector<8x32xf32>
    %109 = math.tanh %108 : vector<8x32xf32>
    %110 = arith.index_cast %104 : i32 to index
    %c0_69 = arith.constant 0 : index
    %111 = vector.load %arg8[%110, %c0_69] : memref<64x32xf32, #tpu.memory_space<vmem>>, vector<8x32xf32>
    tpu.vector_store %arg8[%110, %c0_69], %109 {strides = array<i32>} : memref<64x32xf32, #tpu.memory_space<vmem>>, vector<8x32xf32>,
    %c2_i32_70 = arith.constant 2 : i32
    %c8_i32_71 = arith.constant 8 : i32
    %112 = arith.muli %c2_i32_70, %c8_i32_71 : i32
    %113 = tpu.assume_multiple %112, 8 : i32
    %114 = arith.index_cast %113 : i32 to index
    %c0_72 = arith.constant 0 : index
    %115 = vector.load %arg11[%114, %c0_72] : memref<64x32xf32, #tpu.memory_space<vmem>>, vector<8x32xf32>
    %cst_73 = arith.constant dense<0.000000e+00> : vector<8x32xf32>
    %116 = tpu.matmul %109, %86, %cst_73 {dimension_numbers = #tpu.dot_dimension_numbers<[1], [0], [0], [1], [0, 0, 1, 1], [], []>} : vector<8x32xf32>, vector<32x32xf32>, vector<8x32xf32> -> vector<8x32xf32>
    %117 = arith.addf %115, %116 : vector<8x32xf32>
    %118 = math.tanh %117 : vector<8x32xf32>
    %119 = arith.index_cast %113 : i32 to index
    %c0_74 = arith.constant 0 : index
    %120 = vector.load %arg8[%119, %c0_74] : memref<64x32xf32, #tpu.memory_space<vmem>>, vector<8x32xf32>
    tpu.vector_store %arg8[%119, %c0_74], %118 {strides = array<i32>} : memref<64x32xf32, #tpu.memory_space<vmem>>, vector<8x32xf32>,
    %c3_i32_75 = arith.constant 3 : i32
    %c8_i32_76 = arith.constant 8 : i32
    %121 = arith.muli %c3_i32_75, %c8_i32_76 : i32
    %122 = tpu.assume_multiple %121, 8 : i32
    %123 = arith.index_cast %122 : i32 to index
    %c0_77 = arith.constant 0 : index
    %124 = vector.load %arg11[%123, %c0_77] : memref<64x32xf32, #tpu.memory_space<vmem>>, vector<8x32xf32>
    %cst_78 = arith.constant dense<0.000000e+00> : vector<8x32xf32>
    %125 = tpu.matmul %118, %86, %cst_78 {dimension_numbers = #tpu.dot_dimension_numbers<[1], [0], [0], [1], [0, 0, 1, 1], [], []>} : vector<8x32xf32>, vector<32x32xf32>, vector<8x32xf32> -> vector<8x32xf32>
    %126 = arith.addf %124, %125 : vector<8x32xf32>
    %127 = math.tanh %126 : vector<8x32xf32>
    %128 = arith.index_cast %122 : i32 to index
    %c0_79 = arith.constant 0 : index
    %129 = vector.load %arg8[%128, %c0_79] : memref<64x32xf32, #tpu.memory_space<vmem>>, vector<8x32xf32>
    tpu.vector_store %arg8[%128, %c0_79], %127 {strides = array<i32>} : memref<64x32xf32, #tpu.memory_space<vmem>>, vector<8x32xf32>,
    %c4_i32_80 = arith.constant 4 : i32
    %c8_i32_81 = arith.constant 8 : i32
    %130 = arith.muli %c4_i32_80, %c8_i32_81 : i32
    %131 = tpu.assume_multiple %130, 8 : i32
    %132 = arith.index_cast %131 : i32 to index
    %c0_82 = arith.constant 0 : index
    %133 = vector.load %arg11[%132, %c0_82] : memref<64x32xf32, #tpu.memory_space<vmem>>, vector<8x32xf32>
    %cst_83 = arith.constant dense<0.000000e+00> : vector<8x32xf32>
    %134 = tpu.matmul %127, %86, %cst_83 {dimension_numbers = #tpu.dot_dimension_numbers<[1], [0], [0], [1], [0, 0, 1, 1], [], []>} : vector<8x32xf32>, vector<32x32xf32>, vector<8x32xf32> -> vector<8x32xf32>
    %135 = arith.addf %133, %134 : vector<8x32xf32>
    %136 = math.tanh %135 : vector<8x32xf32>
    %137 = arith.index_cast %131 : i32 to index
    %c0_84 = arith.constant 0 : index
    %138 = vector.load %arg8[%137, %c0_84] : memref<64x32xf32, #tpu.memory_space<vmem>>, vector<8x32xf32>
    tpu.vector_store %arg8[%137, %c0_84], %136 {strides = array<i32>} : memref<64x32xf32, #tpu.memory_space<vmem>>, vector<8x32xf32>,
    %c5_i32_85 = arith.constant 5 : i32
    %c8_i32_86 = arith.constant 8 : i32
    %139 = arith.muli %c5_i32_85, %c8_i32_86 : i32
    %140 = tpu.assume_multiple %139, 8 : i32
    %141 = arith.index_cast %140 : i32 to index
    %c0_87 = arith.constant 0 : index
    %142 = vector.load %arg11[%141, %c0_87] : memref<64x32xf32, #tpu.memory_space<vmem>>, vector<8x32xf32>
    %cst_88 = arith.constant dense<0.000000e+00> : vector<8x32xf32>
    %143 = tpu.matmul %136, %86, %cst_88 {dimension_numbers = #tpu.dot_dimension_numbers<[1], [0], [0], [1], [0, 0, 1, 1], [], []>} : vector<8x32xf32>, vector<32x32xf32>, vector<8x32xf32> -> vector<8x32xf32>
    %144 = arith.addf %142, %143 : vector<8x32xf32>
    %145 = math.tanh %144 : vector<8x32xf32>
    %146 = arith.index_cast %140 : i32 to index
    %c0_89 = arith.constant 0 : index
    %147 = vector.load %arg8[%146, %c0_89] : memref<64x32xf32, #tpu.memory_space<vmem>>, vector<8x32xf32>
    tpu.vector_store %arg8[%146, %c0_89], %145 {strides = array<i32>} : memref<64x32xf32, #tpu.memory_space<vmem>>, vector<8x32xf32>,
    %c6_i32_90 = arith.constant 6 : i32
    %c8_i32_91 = arith.constant 8 : i32
    %148 = arith.muli %c6_i32_90, %c8_i32_91 : i32
    %149 = tpu.assume_multiple %148, 8 : i32
    %150 = arith.index_cast %149 : i32 to index
    %c0_92 = arith.constant 0 : index
    %151 = vector.load %arg11[%150, %c0_92] : memref<64x32xf32, #tpu.memory_space<vmem>>, vector<8x32xf32>
    %cst_93 = arith.constant dense<0.000000e+00> : vector<8x32xf32>
    %152 = tpu.matmul %145, %86, %cst_93 {dimension_numbers = #tpu.dot_dimension_numbers<[1], [0], [0], [1], [0, 0, 1, 1], [], []>} : vector<8x32xf32>, vector<32x32xf32>, vector<8x32xf32> -> vector<8x32xf32>
    %153 = arith.addf %151, %152 : vector<8x32xf32>
    %154 = math.tanh %153 : vector<8x32xf32>
    %155 = arith.index_cast %149 : i32 to index
    %c0_94 = arith.constant 0 : index
    %156 = vector.load %arg8[%155, %c0_94] : memref<64x32xf32, #tpu.memory_space<vmem>>, vector<8x32xf32>
    tpu.vector_store %arg8[%155, %c0_94], %154 {strides = array<i32>} : memref<64x32xf32, #tpu.memory_space<vmem>>, vector<8x32xf32>,
    %c7_i32_95 = arith.constant 7 : i32
    %c8_i32_96 = arith.constant 8 : i32
    %157 = arith.muli %c7_i32_95, %c8_i32_96 : i32
    %158 = tpu.assume_multiple %157, 8 : i32
    %159 = arith.index_cast %158 : i32 to index
    %c0_97 = arith.constant 0 : index
    %160 = vector.load %arg11[%159, %c0_97] : memref<64x32xf32, #tpu.memory_space<vmem>>, vector<8x32xf32>
    %cst_98 = arith.constant dense<0.000000e+00> : vector<8x32xf32>
    %161 = tpu.matmul %154, %86, %cst_98 {dimension_numbers = #tpu.dot_dimension_numbers<[1], [0], [0], [1], [0, 0, 1, 1], [], []>} : vector<8x32xf32>, vector<32x32xf32>, vector<8x32xf32> -> vector<8x32xf32>
    %162 = arith.addf %160, %161 : vector<8x32xf32>
    %163 = math.tanh %162 : vector<8x32xf32>
    %164 = arith.index_cast %158 : i32 to index
    %c0_99 = arith.constant 0 : index
    %165 = vector.load %arg8[%164, %c0_99] : memref<64x32xf32, #tpu.memory_space<vmem>>, vector<8x32xf32>
    tpu.vector_store %arg8[%164, %c0_99], %163 {strides = array<i32>} : memref<64x32xf32, #tpu.memory_space<vmem>>, vector<8x32xf32>,
    %c8_i32_100 = arith.constant 8 : i32
    %c0_101 = arith.constant 0 : index
    %c0_102 = arith.constant 0 : index
    %166 = vector.load %arg10[%c0_101, %c0_102] : memref<8x32xf32, #tpu.memory_space<vmem>>, vector<8x32xf32>
    tpu.vector_store %arg10[%c0_101, %c0_102], %163 {strides = array<i32>} : memref<8x32xf32, #tpu.memory_space<vmem>>, vector<8x32xf32>,
    return
  }
  func.func @transform_0(%arg0: i32) -> (i32, i32) {
    %c0_i32 = arith.constant 0 : i32
    %c0_i32_0 = arith.constant 0 : i32
    return %arg0, %c0_i32 : i32, i32
  }
  func.func @transform_1(%arg0: i32) -> (i32, i32) {
    %c0_i32 = arith.constant 0 : i32
    %c0_i32_0 = arith.constant 0 : i32
    %c0_i32_1 = arith.constant 0 : i32
    return %c0_i32, %c0_i32_0 : i32, i32
  }
  func.func @transform_2(%arg0: i32) -> (i32, i32) {
    %c0_i32 = arith.constant 0 : i32
    %c0_i32_0 = arith.constant 0 : i32
    %c0_i32_1 = arith.constant 0 : i32
    return %c0_i32, %c0_i32_0 : i32, i32
  }
  func.func @transform_3(%arg0: i32) -> (i32, i32) {
    %c0_i32 = arith.constant 0 : i32
    %c0_i32_0 = arith.constant 0 : i32
    %c0_i32_1 = arith.constant 0 : i32
    return %c0_i32, %c0_i32_0 : i32, i32
  }
  func.func @transform_4(%arg0: i32) -> (i32, i32) {
    %c0_i32 = arith.constant 0 : i32
    %c0_i32_0 = arith.constant 0 : i32
    %c0_i32_1 = arith.constant 0 : i32
    return %c0_i32, %c0_i32_0 : i32, i32
  }
  func.func @transform_5(%arg0: i32) -> (i32, i32) {
    %c0_i32 = arith.constant 0 : i32
    %c0_i32_0 = arith.constant 0 : i32
    %c0_i32_1 = arith.constant 0 : i32
    return %c0_i32, %c0_i32_0 : i32, i32
  }
  func.func @transform_6(%arg0: i32) -> (i32, i32) {
    %c0_i32 = arith.constant 0 : i32
    %c0_i32_0 = arith.constant 0 : i32
    %c0_i32_1 = arith.constant 0 : i32
    return %c0_i32, %c0_i32_0 : i32, i32
  }
  func.func @transform_7(%arg0: i32) -> (i32, i32) {
    %c0_i32 = arith.constant 0 : i32
    %c0_i32_0 = arith.constant 0 : i32
    return %arg0, %c0_i32 : i32, i32
  }
}

</mosaic_0001>

<bundles_post_ra>
// kernel: tpu_custom_call.1
= control target key start
LH: loop header
LB: loop body
LE: loop exit
PB: predicated region body
PF: predicated region fallthrough
CT: control target
= control target key end

     0   :  { %12 = vsyncpa [#allocation6], 0  ;;  %s792_s27 = smov [#allocation5]   ;;  %s793_s29 = smov 128   ;;  %s1088_s0 = inlined_call_operand.vmem [shape: f32[64,8], index: 0, kind: input, shape index: {}]   ;;  %s1089_s1 = inlined_call_operand.vmem [shape: f32[8,32], index: 1, kind: input, shape index: {}]   ;;  %s1090_s2 = inlined_call_operand.vmem [shape: f32[32,32], index: 2, kind: input, shape index: {}]   ;;  %s1091_s3 = inlined_call_operand.vmem [shape: f32[1,32], index: 3, kind: input, shape index: {}]   ;;  %s1092_s4 = inlined_call_operand.vmem [shape: f32[32,32], index: 4, kind: input, shape index: {}]   ;;  %s1093_s5 = inlined_call_operand.hbm [shape: f32[32,32], index: 5, kind: input, shape index: {}]   ;;  %s1094_s6 = inlined_call_operand.vmem [shape: f32[1,32], index: 6, kind: input, shape index: {}]   ;;  %s1095_s7 = inlined_call_operand.vmem [shape: f32[64,32], index: 7, kind: output, shape index: {}]  }
   0x1   :  { %s27_s26 = sshll.u32 %s1093_s5, 4  ;;  %s29_s28 = sshll.u32 %s792_s27, 4  ;;  %s28_s26 = int_to_ptr.hbm [resolvable:$true] %s27_s26  ;;  %s30_s28 = int_to_ptr.vmem [resolvable:$true] %s29_s28 }
   0x2   :  { %s794_s30 = smov 8  }
   0x3   :  { %35 = dma.hbm_to_vmem [thread:$0]  %s28_s26, 512, %s30_s28, [#allocation6], %s793_s29, %s793_s29, %s794_s30  }
   0x4   :  { %790 = dma.done.wait [#allocation6], 512  }
   0x5   :  { %791 = vsyncadd [#allocation6], 4294966784  ;;  %vm46_vm0 = vcmask 261120   ;;  %v795_v0 = vmov 0.0   ;;  %vm66_vm1 = vcmask 64512   ;;  %v49_v1 = vld [vmem:[%s1089_s1] sm:$0xff] }
   0x6   :  { %47 = vst.msk [vmem:[#allocation2] sm:$0xff] %vm46_vm0, %v795_v0  ;;  %v55_v2 = vld [vmem:[%s1088_s0] sm:$0xff]  ;;  %v850_v3 = vld [vmem:[%s1090_s2 + $0x18] sm:$0xff]  ;;  %106 = vmatpush.msra.mxu0 %v49_v1  ;;  %v856_v4 = vld [vmem:[%s1090_s2 + $0x10] sm:$0xff] }
   0x7   :  { %48 = vst.msk [vmem:[#allocation3] sm:$0xff] %vm46_vm0, %v795_v0  ;;  %158 = vmatpush.msra.mxu1 %v850_v3  ;;  %689 = vmatmul.msk.f32.vlgmr.msra.gmra.mxu0 %vm66_vm1, %v55_v2  ;;  %v862_v5 = vld [vmem:[%s1090_s2 + $0x8] sm:$0xff]  ;;  %v869_v6 = vld [vmem:[%s1090_s2] sm:$0xff]  ;;  %v369_v9 = vld [vmem:[%s1092_s4 + $0x18] sm:$0xff] }
   0x8   :  { %186 = vmatpush.msra.mxu2 %v850_v3  ;;  %v56_v8 = vld [vmem:[%s1088_s0 + $0x8] sm:$0xff]  ;;  %v368_v10 = vld [vmem:[%s1092_s4 + $0x10] sm:$0xff]  ;;  %422 = vmatpush.msra.mxu3 %v369_v9  ;;  %v366_v12 = vld [vmem:[%s1092_s4] sm:$0xff] }
   0x9   :  { %159 = vmatpush.msra.mxu1 %v856_v4  ;;  %v367_v11 = vld [vmem:[%s1092_s4 + $0x8] sm:$0xff]  ;;  %v908_v13 = vld [vmem:[%s1091_s3] ss:$0 sm:$0xff]  ;;  %v57_v21 = vld [vmem:[%s1088_s0 + $0x10] sm:$0xff] }
   0xa   :  { %187 = vmatpush.msra.mxu2 %v856_v4  ;;  %423 = vmatpush.msra.mxu3 %v368_v10  ;;  %v928_v27 = vld [vmem:[%s1094_s6] ss:$0 sm:$0xff]  ;;  %v58_v32 = vld [vmem:[%s1088_s0 + $0x18] sm:$0xff]  ;;  %v60_v54 = vld [vmem:[%s1088_s0 + $0x28] sm:$0xff] }
   0xb   :  { %160 = vmatpush.msra.mxu1 %v862_v5  ;;  %v59_v44 = vld [vmem:[%s1088_s0 + $0x20] sm:$0xff]  ;;  %v61_v62 = vld [vmem:[%s1088_s0 + $0x30] sm:$0xff]  ;;  %v982_v1 = vld [vmem:[#allocation5 + $0x18] sm:$0xff] }
   0xc   :  { %188 = vmatpush.msra.mxu2 %v862_v5  ;;  %424 = vmatpush.msra.mxu3 %v367_v11  ;;  %v985_v2 = vld [vmem:[#allocation5 + $0x10] sm:$0xff] }
   0xd   :  { %v141_v7 = vld [vmem:[#allocation2] sm:$0xff]  ;;  %161 = vmatpush.msra.mxu1 %v869_v6 }
   0xe   :  { %697 = vmatmul.msk.f32.vlgmr.msra.gmra.mxu1 %vm46_vm0, %v141_v7  ;;  %189 = vmatpush.msra.mxu2 %v869_v6  ;;  %v459_v11 = vld [vmem:[#allocation3] sm:$0xff] }
   0xf   :  { %214 = vmatpush.msrb.mxu1 %v850_v3  ;;  %690 = vmatmul.msk.f32.gmra.mxu0 %vm66_vm1, %v56_v8 }
  0x10   :  { %270 = vmatpush.msrb.mxu2 %v850_v3  ;;  %425 = vmatpush.msra.mxu3 %v366_v12 }
  0x11   :  { %215 = vmatpush.msrb.mxu1 %v856_v4 }
  0x12   :  { %271 = vmatpush.msrb.mxu2 %v856_v4 }
  0x13   :  { %216 = vmatpush.msrb.mxu1 %v862_v5 }
  0x14   :  { %272 = vmatpush.msrb.mxu2 %v862_v5 }
  0x15   :  { %217 = vmatpush.msrb.mxu1 %v869_v6 }
  0x16   :  { %273 = vmatpush.msrb.mxu2 %v869_v6 }
  0x17   :  { %242 = vmatpush.msra.mxu1 %v850_v3  ;;  %691 = vmatmul.msk.f32.gmra.mxu0 %vm66_vm1, %v57_v21 }
  0x19   :  { %243 = vmatpush.msra.mxu1 %v856_v4 }
  0x1b   :  { %244 = vmatpush.msra.mxu1 %v862_v5 }
  0x1d   :  { %245 = vmatpush.msra.mxu1 %v869_v6 }
  0x1f   :  { %692 = vmatmul.msk.f32.gmra.mxu0 %vm66_vm1, %v58_v32 }
  0x27   :  { %693 = vmatmul.msk.f32.gmra.mxu0 %vm66_vm1, %v59_v44 }
  0x2f   :  { %694 = vmatmul.msk.f32.gmra.mxu0 %vm66_vm1, %v60_v54 }
  0x37   :  { %695 = vmatmul.msk.f32.gmra.mxu0 %vm66_vm1, %v61_v62 }
  0x84   :  { %v108_v14 = vpop.f32.mrf.mxu0 }
  0x85   :  { %v109_v15 = vadd.f32 %v908_v13, %v108_v14 }
  0x87   :  { %133 = vst.msk [vmem:[#allocation4] sm:$0xff] %vm46_vm0, %v109_v15 }
  0x8b   :  { %v163_v16 = vpop.f32.mrf.mxu1 }
  0x8c   :  { %v111_v22 = vpop.f32.mrf.mxu0 }
  0x8d   :  { %v112_v23 = vadd.f32 %v908_v13, %v111_v22 }
  0x8e   :  { %v142_v17 = vld [vmem:[#allocation4] sm:$0xff] }
  0x8f   :  { %v166_v18 = vadd.f32 %v163_v16, %v142_v17  ;;  %134 = vst.msk [vmem:[#allocation4 + $0x8] sm:$0xff] %vm46_vm0, %v112_v23  ;;  %v62_v16 = vld [vmem:[%s1088_s0 + $0x38] sm:$0xff] }
  0x90   :  { %696 = vmatmul.msk.f32.gmra.mxu0 %vm66_vm1, %v62_v16 }
  0x91   :  { %734 = vtanh.f32 %v166_v18 }
  0x94   :  { %v114_v33 = vpop.f32.mrf.mxu0 }
  0x95   :  { %v115_v34 = vadd.f32 %v908_v13, %v114_v33 }
  0x96   :  { %v170_v24 = vld [vmem:[#allocation4 + $0x8] sm:$0xff] }
  0x97   :  { %v735_v19 = vpop.eup %734  ;;  %135 = vst.msk [vmem:[#allocation4 + $0x10] sm:$0xff] %vm46_vm0, %v115_v34 }
  0x98   :  { %168 = vst.msk [vmem:[#allocation4] sm:$0xff] %vm46_vm0, %v735_v19  ;;  %698 = vmatmul.msk.f32.vlgmr.msra.gmra.mxu2 %vm46_vm0, %v735_v19 }
  0x99   :  { %298 = vmatpush.msra.mxu2 %v850_v3 }
  0x9b   :  { %299 = vmatpush.msra.mxu2 %v856_v4 }
  0x9c   :  { %v117_v42 = vpop.f32.mrf.mxu0 }
  0x9d   :  { %300 = vmatpush.msra.mxu2 %v862_v5  ;;  %v118_v43 = vadd.f32 %v908_v13, %v117_v42 }
  0x9e   :  { %v198_v35 = vld [vmem:[#allocation4 + $0x10] sm:$0xff] }
  0x9f   :  { %v375_v20 = vld [vmem:[#allocation4] sm:$0xff]  ;;  %301 = vmatpush.msra.mxu2 %v869_v6  ;;  %136 = vst.msk [vmem:[#allocation4 + $0x18] sm:$0xff] %vm46_vm0, %v118_v43 }
  0xa0   :  { %705 = vmatmul.msk.f32.vlgmr.msra.gmra.mxu3 %vm46_vm0, %v375_v20 }
  0xa4   :  { %v120_v52 = vpop.f32.mrf.mxu0 }
  0xa5   :  { %v121_v53 = vadd.f32 %v908_v13, %v120_v52 }
  0xa6   :  { %v226_v45 = vld [vmem:[#allocation4 + $0x18] sm:$0xff] }
  0xa7   :  { %137 = vst.msk [vmem:[#allocation4 + $0x20] sm:$0xff] %vm46_vm0, %v121_v53 }
  0xac   :  { %v123_v63 = vpop.f32.mrf.mxu0 }
  0xad   :  { %v124_v0 = vadd.f32 %v908_v13, %v123_v63 }
  0xae   :  { %v254_v55 = vld [vmem:[#allocation4 + $0x20] sm:$0xff] }
  0xaf   :  { %138 = vst.msk [vmem:[#allocation4 + $0x28] sm:$0xff] %vm46_vm0, %v124_v0 }
  0xb4   :  { %v126_v14 = vpop.f32.mrf.mxu0 }
  0xb5   :  { %v127_v15 = vadd.f32 %v908_v13, %v126_v14 }
  0xb7   :  { %139 = vst.msk [vmem:[#allocation4 + $0x30] sm:$0xff] %vm46_vm0, %v127_v15 }
  0xbe   :  { %v310_v17 = vld [vmem:[#allocation4 + $0x30] sm:$0xff] }
 0x11b   :  { %v191_v25 = vpop.f32.mrf.mxu2 }
 0x11c   :  { %v194_v26 = vadd.f32 %v191_v25, %v170_v24 }
 0x11e   :  { %736 = vtanh.f32 %v194_v26 }
 0x123   :  { %v427_v28 = vpop.f32.mrf.mxu3 }
 0x124   :  { %v737_v29 = vpop.eup %736  ;;  %v428_v30 = vadd.f32 %v928_v27, %v427_v28 }
 0x125   :  { %196 = vst.msk [vmem:[#allocation4 + $0x8] sm:$0xff] %vm46_vm0, %v737_v29  ;;  %699 = vmatmul.msk.f32.vlgmr.msrb.gmra.mxu1 %vm46_vm0, %v737_v29  ;;  %v129_v29 = vpop.f32.mrf.mxu0 }
 0x126   :  { %451 = vst.msk [vmem:[#allocation4] sm:$0xff] %vm46_vm0, %v428_v30  ;;  %326 = vmatpush.msrb.mxu1 %v850_v3  ;;  %v130_v30 = vadd.f32 %v908_v13, %v129_v29 }
 0x128   :  { %327 = vmatpush.msrb.mxu1 %v856_v4  ;;  %140 = vst.msk [vmem:[#allocation4 + $0x38] sm:$0xff] %vm46_vm0, %v130_v30 }
 0x12a   :  { %328 = vmatpush.msrb.mxu1 %v862_v5 }
 0x12c   :  { %v376_v31 = vld [vmem:[#allocation4 + $0x8] sm:$0xff]  ;;  %329 = vmatpush.msrb.mxu1 %v869_v6 }
 0x12d   :  { %706 = vmatmul.msk.f32.gmra.mxu3 %vm46_vm0, %v376_v31  ;;  %v460_v20 = vld [vmem:[#allocation4] sm:$0xff] }
 0x12f   :  { %v338_v31 = vld [vmem:[#allocation4 + $0x38] sm:$0xff] }
 0x1a2   :  { %v219_v36 = vpop.f32.mrf.mxu1 }
 0x1a3   :  { %v222_v37 = vadd.f32 %v219_v36, %v198_v35 }
 0x1a5   :  { %738 = vtanh.f32 %v222_v37 }
 0x1ab   :  { %v739_v38 = vpop.eup %738 }
 0x1ac   :  { %224 = vst.msk [vmem:[#allocation4 + $0x10] sm:$0xff] %vm46_vm0, %v739_v38  ;;  %700 = vmatmul.msk.f32.vlgmr.msra.gmra.mxu1 %vm46_vm0, %v739_v38 }
 0x1ad   :  { %476 = vmatpush.msra.mxu1 %v982_v1 }
 0x1af   :  { %477 = vmatpush.msra.mxu1 %v985_v2 }
 0x1b0   :  { %v430_v39 = vpop.f32.mrf.mxu3 }
 0x1b1   :  { %v431_v40 = vadd.f32 %v928_v27, %v430_v39 }
 0x1b3   :  { %452 = vst.msk [vmem:[#allocation4 + $0x8] sm:$0xff] %vm46_vm0, %v431_v40  ;;  %v377_v41 = vld [vmem:[#allocation4 + $0x10] sm:$0xff] }
 0x1b4   :  { %707 = vmatmul.msk.f32.gmra.mxu3 %vm46_vm0, %v377_v41 }
 0x1ba   :  { %v487_v35 = vld [vmem:[#allocation4 + $0x8] sm:$0xff] }
 0x229   :  { %v247_v46 = vpop.f32.mrf.mxu1 }
 0x22a   :  { %v250_v47 = vadd.f32 %v247_v46, %v226_v45 }
 0x22c   :  { %740 = vtanh.f32 %v250_v47 }
 0x232   :  { %v741_v48 = vpop.eup %740 }
 0x233   :  { %252 = vst.msk [vmem:[#allocation4 + $0x18] sm:$0xff] %vm46_vm0, %v741_v48  ;;  %701 = vmatmul.msk.f32.vlgmr.msrb.gmra.mxu2 %vm46_vm0, %v741_v48 }
 0x234   :  { %354 = vmatpush.msrb.mxu2 %v850_v3  ;;  %v988_v3 = vld [vmem:[#allocation5 + $0x8] sm:$0xff] }
 0x235   :  { %478 = vmatpush.msra.mxu1 %v988_v3 }
 0x236   :  { %355 = vmatpush.msrb.mxu2 %v856_v4  ;;  %v992_v4 = vld [vmem:[#allocation5] sm:$0xff] }
 0x237   :  { %v433_v49 = vpop.f32.mrf.mxu3  ;;  %479 = vmatpush.msra.mxu1 %v992_v4 }
 0x238   :  { %v434_v50 = vadd.f32 %v928_v27, %v433_v49  ;;  %356 = vmatpush.msrb.mxu2 %v862_v5  ;;  %v282_v5 = vld [vmem:[#allocation4 + $0x28] sm:$0xff] }
 0x23a   :  { %453 = vst.msk [vmem:[#allocation4 + $0x10] sm:$0xff] %vm46_vm0, %v434_v50  ;;  %v378_v51 = vld [vmem:[#allocation4 + $0x18] sm:$0xff]  ;;  %357 = vmatpush.msrb.mxu2 %v869_v6 }
 0x23b   :  { %708 = vmatmul.msk.f32.gmra.mxu3 %vm46_vm0, %v378_v51 }
 0x241   :  { %v515_v41 = vld [vmem:[#allocation4 + $0x10] sm:$0xff] }
 0x2b6   :  { %v275_v56 = vpop.f32.mrf.mxu2 }
 0x2b7   :  { %v278_v57 = vadd.f32 %v275_v56, %v254_v55 }
 0x2b9   :  { %742 = vtanh.f32 %v278_v57 }
 0x2be   :  { %v436_v58 = vpop.f32.mrf.mxu3 }
 0x2bf   :  { %v743_v59 = vpop.eup %742  ;;  %v437_v60 = vadd.f32 %v928_v27, %v436_v58 }
 0x2c0   :  { %280 = vst.msk [vmem:[#allocation4 + $0x20] sm:$0xff] %vm46_vm0, %v743_v59  ;;  %702 = vmatmul.msk.f32.vlgmr.msra.gmra.mxu2 %vm46_vm0, %v743_v59 }
 0x2c1   :  { %454 = vst.msk [vmem:[#allocation4 + $0x18] sm:$0xff] %vm46_vm0, %v437_v60  ;;  %503 = vmatpush.msra.mxu2 %v982_v1 }
 0x2c3   :  { %504 = vmatpush.msra.mxu2 %v985_v2 }
 0x2c5   :  { %505 = vmatpush.msra.mxu2 %v988_v3 }
 0x2c7   :  { %v379_v61 = vld [vmem:[#allocation4 + $0x20] sm:$0xff]  ;;  %506 = vmatpush.msra.mxu2 %v992_v4 }
 0x2c8   :  { %709 = vmatmul.msk.f32.gmra.mxu3 %vm46_vm0, %v379_v61  ;;  %v543_v47 = vld [vmem:[#allocation4 + $0x18] sm:$0xff] }
 0x343   :  { %v303_v6 = vpop.f32.mrf.mxu2 }
 0x344   :  { %v306_v7 = vadd.f32 %v303_v6, %v282_v5 }
 0x346   :  { %744 = vtanh.f32 %v306_v7 }
 0x34b   :  { %v439_v8 = vpop.f32.mrf.mxu3 }
 0x34c   :  { %v745_v9 = vpop.eup %744  ;;  %v440_v10 = vadd.f32 %v928_v27, %v439_v8 }
 0x34d   :  { %308 = vst.msk [vmem:[#allocation4 + $0x28] sm:$0xff] %vm46_vm0, %v745_v9  ;;  %703 = vmatmul.msk.f32.vlgmr.msrb.gmra.mxu1 %vm46_vm0, %v745_v9 }
 0x34e   :  { %455 = vst.msk [vmem:[#allocation4 + $0x20] sm:$0xff] %vm46_vm0, %v440_v10  ;;  %531 = vmatpush.msrb.mxu1 %v982_v1 }
 0x350   :  { %532 = vmatpush.msrb.mxu1 %v985_v2 }
 0x352   :  { %533 = vmatpush.msrb.mxu1 %v988_v3 }
 0x354   :  { %v380_v12 = vld [vmem:[#allocation4 + $0x28] sm:$0xff]  ;;  %534 = vmatpush.msrb.mxu1 %v992_v4 }
 0x355   :  { %710 = vmatmul.msk.f32.gmra.mxu3 %vm46_vm0, %v380_v12  ;;  %713 = vmatmul.msk.f32.vlgmr.msra.gmra.mxu1 %vm46_vm0, %v459_v11  ;;  %v571_v50 = vld [vmem:[#allocation4 + $0x20] sm:$0xff] }
 0x356   :  { %587 = vmatpush.msra.mxu1 %v982_v1 }
 0x358   :  { %588 = vmatpush.msra.mxu1 %v985_v2 }
 0x35a   :  { %589 = vmatpush.msra.mxu1 %v988_v3 }
 0x35c   :  { %590 = vmatpush.msra.mxu1 %v992_v4 }
 0x3ca   :  { %v331_v18 = vpop.f32.mrf.mxu1 }
 0x3cb   :  { %v334_v19 = vadd.f32 %v331_v18, %v310_v17 }
 0x3cd   :  { %746 = vtanh.f32 %v334_v19 }
 0x3d2   :  { %v481_v21 = vpop.f32.mrf.mxu1 }
 0x3d3   :  { %v747_v22 = vpop.eup %746  ;;  %v484_v23 = vadd.f32 %v481_v21, %v460_v20 }
 0x3d4   :  { %336 = vst.msk [vmem:[#allocation4 + $0x30] sm:$0xff] %vm46_vm0, %v747_v22  ;;  %704 = vmatmul.msk.f32.vlgmr.msrb.gmra.mxu2 %vm46_vm0, %v747_v22 }
 0x3d5   :  { %748 = vtanh.f32 %v484_v23  ;;  %559 = vmatpush.msrb.mxu2 %v982_v1 }
 0x3d7   :  { %560 = vmatpush.msrb.mxu2 %v985_v2 }
 0x3d8   :  { %v442_v24 = vpop.f32.mrf.mxu3 }
 0x3d9   :  { %v443_v25 = vadd.f32 %v928_v27, %v442_v24  ;;  %561 = vmatpush.msrb.mxu2 %v988_v3 }
 0x3db   :  { %v749_v26 = vpop.eup %748  ;;  %456 = vst.msk [vmem:[#allocation4 + $0x28] sm:$0xff] %vm46_vm0, %v443_v25  ;;  %v381_v28 = vld [vmem:[#allocation4 + $0x30] sm:$0xff]  ;;  %562 = vmatpush.msrb.mxu2 %v992_v4 }
 0x3dc   :  { %486 = vst.msk [vmem:[%s1095_s7] sm:$0xff] %vm46_vm0, %v749_v26  ;;  %711 = vmatmul.msk.f32.gmra.mxu3 %vm46_vm0, %v381_v28  ;;  %714 = vmatmul.msk.f32.vlgmr.msra.gmra.mxu2 %vm46_vm0, %v749_v26 }
 0x3dd   :  { %615 = vmatpush.msra.mxu2 %v982_v1 }
 0x3df   :  { %616 = vmatpush.msra.mxu2 %v985_v2 }
 0x3e1   :  { %617 = vmatpush.msra.mxu2 %v988_v3 }
 0x3e2   :  { %v599_v54 = vld [vmem:[#allocation4 + $0x28] sm:$0xff] }
 0x3e3   :  { %618 = vmatpush.msra.mxu2 %v992_v4 }
 0x457   :  { %v359_v32 = vpop.f32.mrf.mxu2 }
 0x458   :  { %v362_v33 = vadd.f32 %v359_v32, %v338_v31 }
 0x45a   :  { %750 = vtanh.f32 %v362_v33 }
 0x45f   :  { %v445_v34 = vpop.f32.mrf.mxu3  ;;  %v508_v36 = vpop.f32.mrf.mxu2 }
 0x460   :  { %v751_v37 = vpop.eup %750  ;;  %v446_v38 = vadd.f32 %v928_v27, %v445_v34  ;;  %v511_v39 = vadd.f32 %v508_v36, %v487_v35 }
 0x461   :  { %364 = vst.msk [vmem:[#allocation4 + $0x38] sm:$0xff] %vm46_vm0, %v751_v37 }
 0x462   :  { %365 = vst.msk [vmem:[#allocation2] sm:$0xff] %vm46_vm0, %v751_v37  ;;  %752 = vtanh.f32 %v511_v39 }
 0x463   :  { %457 = vst.msk [vmem:[#allocation4 + $0x30] sm:$0xff] %vm46_vm0, %v446_v38 }
 0x468   :  { %v753_v13 = vpop.eup %752  ;;  %v382_v40 = vld [vmem:[#allocation4 + $0x38] sm:$0xff] }
 0x469   :  { %715 = vst.msk [vmem:[%s1095_s7 + $0x8] sm:$0xff] %vm46_vm0, %v753_v13  ;;  %712 = vmatmul.msk.f32.gmra.mxu3 %vm46_vm0, %v382_v40  ;;  %716 = vmatmul.msk.f32.vlgmr.msrb.gmra.mxu1 %vm46_vm0, %v753_v13 }
 0x46a   :  { %643 = vmatpush.msrb.mxu1 %v982_v1  ;;  %v627_v58 = vld [vmem:[#allocation4 + $0x30] sm:$0xff] }
 0x46c   :  { %644 = vmatpush.msrb.mxu1 %v985_v2 }
 0x46e   :  { %645 = vmatpush.msrb.mxu1 %v988_v3 }
 0x470   :  { %646 = vmatpush.msrb.mxu1 %v992_v4 }
 0x4e6   :  { %v536_v42 = vpop.f32.mrf.mxu1 }
 0x4e7   :  { %v539_v43 = vadd.f32 %v536_v42, %v515_v41 }
 0x4e9   :  { %754 = vtanh.f32 %v539_v43 }
 0x4ec   :  { %v448_v44 = vpop.f32.mrf.mxu3 }
 0x4ed   :  { %v449_v45 = vadd.f32 %v928_v27, %v448_v44 }
 0x4ef   :  { %v755_v46 = vpop.eup %754  ;;  %458 = vst.msk [vmem:[#allocation4 + $0x38] sm:$0xff] %vm46_vm0, %v449_v45 }
 0x4f0   :  { %717 = vst.msk [vmem:[%s1095_s7 + $0x10] sm:$0xff] %vm46_vm0, %v755_v46  ;;  %718 = vmatmul.msk.f32.vlgmr.msrb.gmra.mxu2 %vm46_vm0, %v755_v46 }
 0x4f1   :  { %671 = vmatpush.msrb.mxu2 %v982_v1 }
 0x4f3   :  { %672 = vmatpush.msrb.mxu2 %v985_v2 }
 0x4f5   :  { %673 = vmatpush.msrb.mxu2 %v988_v3 }
 0x4f6   :  { %v655_v62 = vld [vmem:[#allocation4 + $0x38] sm:$0xff] }
 0x4f7   :  { %674 = vmatpush.msrb.mxu2 %v992_v4 }
 0x573   :  { %v564_v27 = vpop.f32.mrf.mxu2 }
 0x574   :  { %v567_v48 = vadd.f32 %v564_v27, %v543_v47 }
 0x576   :  { %756 = vtanh.f32 %v567_v48 }
 0x57c   :  { %v757_v49 = vpop.eup %756 }
 0x57d   :  { %719 = vst.msk [vmem:[%s1095_s7 + $0x18] sm:$0xff] %vm46_vm0, %v757_v49  ;;  %720 = vmatmul.msk.f32.vlgmr.msra.gmra.mxu1 %vm46_vm0, %v757_v49 }
 0x5fa   :  { %v592_v51 = vpop.f32.mrf.mxu1 }
 0x5fb   :  { %v595_v52 = vadd.f32 %v592_v51, %v571_v50 }
 0x5fd   :  { %758 = vtanh.f32 %v595_v52 }
 0x603   :  { %v759_v53 = vpop.eup %758 }
 0x604   :  { %721 = vst.msk [vmem:[%s1095_s7 + $0x20] sm:$0xff] %vm46_vm0, %v759_v53  ;;  %722 = vmatmul.msk.f32.vlgmr.msra.gmra.mxu2 %vm46_vm0, %v759_v53 }
 0x687   :  { %v620_v55 = vpop.f32.mrf.mxu2 }
 0x688   :  { %v623_v56 = vadd.f32 %v620_v55, %v599_v54 }
 0x68a   :  { %760 = vtanh.f32 %v623_v56 }
 0x690   :  { %v761_v57 = vpop.eup %760 }
 0x691   :  { %723 = vst.msk [vmem:[%s1095_s7 + $0x28] sm:$0xff] %vm46_vm0, %v761_v57  ;;  %724 = vmatmul.msk.f32.vlgmr.msrb.gmra.mxu1 %vm46_vm0, %v761_v57 }
 0x70e   :  { %v648_v59 = vpop.f32.mrf.mxu1 }
 0x70f   :  { %v651_v60 = vadd.f32 %v648_v59, %v627_v58 }
 0x711   :  { %762 = vtanh.f32 %v651_v60 }
 0x717   :  { %v763_v61 = vpop.eup %762 }
 0x718   :  { %725 = vst.msk [vmem:[%s1095_s7 + $0x30] sm:$0xff] %vm46_vm0, %v763_v61  ;;  %726 = vmatmul.msk.f32.vlgmr.msrb.gmra.mxu2 %vm46_vm0, %v763_v61 }
 0x79b   :  { %v676_v63 = vpop.f32.mrf.mxu2 }
 0x79c   :  { %v679_v0 = vadd.f32 %v676_v63, %v655_v62 }
 0x79e   :  { %764 = vtanh.f32 %v679_v0 }
 0x7a4   :  { %v765_v1 = vpop.eup %764 }
 0x7a5   :  { %727 = vst.msk [vmem:[%s1095_s7 + $0x38] sm:$0xff] %vm46_vm0, %v765_v1 }
 0x7a6   :  { %683 = vst.msk [vmem:[#allocation3] sm:$0xff] %vm46_vm0, %v765_v1 }
 0x7a7   :  { %688 = vsyncpa [#allocation6], 1 }

</bundles_post_ra>
